<compile_context>
chip_gen: v7x
topology: tpu7x:2x2x1
jax: 0.10.0
libtpu: 0.0.40
codegen_flags: <defaults>
</compile_context>

<pallas_src>
import jax
import jax.numpy as jnp
from jax.experimental import pallas as pl
from jax.experimental.pallas import tpu as pltpu


def _round_up(x, m):
    return (x + m - 1) // m * m


def _mse_kernel(out_ref, gt_ref, mask_ref, sse_ref, den_ref):
    """One (TB, CHW) tile of flattened samples per grid step.

    Grid is (batch_tiles, hw_chunks). The outputs (per-sample sse / mask-sum,
    shape (TB, 1)) stay resident across the hw_chunks axis and are accumulated
    there; the batch axis is fully parallel.
    """
    j = pl.program_id(1)

    @pl.when(j == 0)
    def _():
        sse_ref[...] = jnp.zeros_like(sse_ref)
        den_ref[...] = jnp.zeros_like(den_ref)

    o = out_ref[...].astype(jnp.float32)
    g = gt_ref[...].astype(jnp.float32)
    m = mask_ref[...].astype(jnp.float32)

    # yhat = output*mask ; gtruth = groundtruth*mask ; (yhat - gtruth)^2
    diff = (o - g) * m
    sse_ref[...] += jnp.sum(diff * diff, axis=-1, keepdims=True)
    den_ref[...] += jnp.sum(m, axis=-1, keepdims=True)


def mse_loss(output, groundtruth, mask):
    B, H, W = output.shape
    HW = H * W

    LANE, SUB = 128, 8
    # ~1 MiB (f32) per input tile: big enough to amortize the ~0.35 us/step
    # grid overhead, small enough that 3 inputs x 2 buffers ~= 6 MiB fits the
    # scoped-VMEM default on v5e/v6e/v7x with headroom.
    E_TARGET = 256 * 1024

    # Lane-chunk of the flattened H*W axis (multiple of 128).
    chw_cap = max(LANE, (E_TARGET // SUB // LANE) * LANE)
    chw = min(_round_up(HW, LANE), chw_cap)
    hw_pad = _round_up(HW, chw)
    nc = hw_pad // chw

    # Batch tile: as many samples as fit the element budget.
    tb_max = max(SUB, E_TARGET // chw)
    if B <= tb_max:
        tb = B                      # full batch dim -> always a legal block
        b_pad = B
    else:
        tb = (tb_max // SUB) * SUB  # multiple of 8 sublanes
        b_pad = _round_up(B, tb)
    nb = b_pad // tb

    def prep(x):
        x = x.reshape(B, HW)
        if b_pad != B or hw_pad != HW:
            # zero padding contributes 0 to both sse and mask-sum
            x = jnp.pad(x, ((0, b_pad - B), (0, hw_pad - HW)))
        return x

    o2, g2, m2 = prep(output), prep(groundtruth), prep(mask)

    in_spec = pl.BlockSpec((tb, chw), lambda i, j: (i, j))
    out_spec = pl.BlockSpec((tb, 1), lambda i, j: (i, 0))

    sse, den = pl.pallas_call(
        _mse_kernel,
        out_shape=(
            jax.ShapeDtypeStruct((b_pad, 1), jnp.float32),
            jax.ShapeDtypeStruct((b_pad, 1), jnp.float32),
        ),
        grid_spec=pltpu.PrefetchScalarGridSpec(
            num_scalar_prefetch=0,
            grid=(nb, nc),
            in_specs=[in_spec, in_spec, in_spec],
            out_specs=[out_spec, out_spec],
        ),
        compiler_params=pltpu.CompilerParams(
            dimension_semantics=("parallel", "arbitrary"),
        ),
    )(o2, g2, m2)

    # JAX epilogue: per-sample normalization + batch mean (vectorized divide,
    # padded rows are sliced away before dividing so no spurious 0/0).
    sse = sse[:B, 0]
    den = den[:B, 0]
    # Note: a real sample with an all-zero mask yields NaN/Inf, matching the
    # PyTorch reference semantics.
    return jnp.mean(sse / den)


if __name__ == "__main__":
    key = jax.random.PRNGKey(0)
    k1, k2, k3 = jax.random.split(key, 3)

    B, H, W = 2, 16, 16
    output = jax.random.normal(k1, (B, H, W), dtype=jnp.float32)
    groundtruth = jax.random.normal(k2, (B, H, W), dtype=jnp.float32)
    # binary-ish mask, guaranteed nonzero sum per sample
    mask = (jax.random.uniform(k3, (B, H, W)) > 0.3).astype(jnp.float32)
    mask = mask.at[:, 0, 0].set(1.0)

    ans = mse_loss(output, groundtruth, mask)
    jax.block_until_ready(ans)

    # cross-check against pure-JAX reference (mirrors the PyTorch module)
    yhat = output * mask
    gt = groundtruth * mask
    ref = jnp.mean(jnp.sum((yhat - gt) ** 2, axis=(1, 2)) / jnp.sum(mask, axis=(1, 2)))
    assert jnp.allclose(ans, ref, rtol=1e-5, atol=1e-6), (ans, ref)

    print("KERNEL_OK")
</pallas_src>

<mosaic_0001>
module attributes {stable_mosaic.version = 11 : i64} {
  func.func @_mse_kernel(%arg0: i32, %arg1: i32, %arg2: memref<2x256xf32, #tpu.memory_space<vmem>>, %arg3: memref<2x256xf32, #tpu.memory_space<vmem>>, %arg4: memref<2x256xf32, #tpu.memory_space<vmem>>, %arg5: memref<2x1xf32, #tpu.memory_space<vmem>>, %arg6: memref<2x1xf32, #tpu.memory_space<vmem>>) attributes {dimension_semantics = [#tpu.dimension_semantics<parallel>, #tpu.dimension_semantics<arbitrary>], iteration_bounds = array<i64: 1, 1>, scalar_prefetch = 0 : i64, scratch_operands = 0 : i64, tpu.core_type = #tpu.core_type<tc>, window_params = [{transform_indices = @transform_0, window_bounds = array<i64: 2, 256>}, {transform_indices = @transform_1, window_bounds = array<i64: 2, 256>}, {transform_indices = @transform_2, window_bounds = array<i64: 2, 256>}, {transform_indices = @transform_3, window_bounds = array<i64: 2, 1>}, {transform_indices = @transform_4, window_bounds = array<i64: 2, 1>}]} {
    %c0_i32 = arith.constant 0 : i32
    %0 = arith.cmpi eq, %arg1, %c0_i32 : i32
    %1 = arith.extui %0 : i1 to i32
    %c0_i32_0 = arith.constant 0 : i32
    %2 = arith.cmpi ne, %1, %c0_i32_0 : i32
    scf.if %2 {
      %cst_15 = arith.constant 0.000000e+00 : f32
      %19 = vector.broadcast %cst_15 : f32 to vector<2x1xf32>
      %c0_16 = arith.constant 0 : index
      %c0_17 = arith.constant 0 : index
      %20 = vector.load %arg5[%c0_16, %c0_17] : memref<2x1xf32, #tpu.memory_space<vmem>>, vector<2x1xf32>
      tpu.vector_store %arg5[%c0_16, %c0_17], %19 {strides = array<i32>} : memref<2x1xf32, #tpu.memory_space<vmem>>, vector<2x1xf32>,
      %cst_18 = arith.constant 0.000000e+00 : f32
      %21 = vector.broadcast %cst_18 : f32 to vector<2x1xf32>
      %c0_19 = arith.constant 0 : index
      %c0_20 = arith.constant 0 : index
      %22 = vector.load %arg6[%c0_19, %c0_20] : memref<2x1xf32, #tpu.memory_space<vmem>>, vector<2x1xf32>
      tpu.vector_store %arg6[%c0_19, %c0_20], %21 {strides = array<i32>} : memref<2x1xf32, #tpu.memory_space<vmem>>, vector<2x1xf32>,
    } else {
    }
    %c0 = arith.constant 0 : index
    %c0_1 = arith.constant 0 : index
    %3 = vector.load %arg2[%c0, %c0_1] : memref<2x256xf32, #tpu.memory_space<vmem>>, vector<2x256xf32>
    %c0_2 = arith.constant 0 : index
    %c0_3 = arith.constant 0 : index
    %4 = vector.load %arg3[%c0_2, %c0_3] : memref<2x256xf32, #tpu.memory_space<vmem>>, vector<2x256xf32>
    %c0_4 = arith.constant 0 : index
    %c0_5 = arith.constant 0 : index
    %5 = vector.load %arg4[%c0_4, %c0_5] : memref<2x256xf32, #tpu.memory_space<vmem>>, vector<2x256xf32>
    %6 = arith.subf %3, %4 : vector<2x256xf32>
    %7 = arith.mulf %6, %5 : vector<2x256xf32>
    %c0_6 = arith.constant 0 : index
    %c0_7 = arith.constant 0 : index
    %8 = vector.load %arg5[%c0_6, %c0_7] : memref<2x1xf32, #tpu.memory_space<vmem>>, vector<2x1xf32>
    %9 = arith.mulf %7, %7 : vector<2x256xf32>
    %cst = arith.constant dense<0.000000e+00> : vector<2xf32>
    %10 = vector.multi_reduction <add>, %9, %cst [1] : vector<2x256xf32> to vector<2xf32>
    %11 = vector.shape_cast %10 : vector<2xf32> to vector<2x1xf32>
    %12 = arith.addf %8, %11 : vector<2x1xf32>
    %c0_8 = arith.constant 0 : index
    %c0_9 = arith.constant 0 : index
    %13 = vector.load %arg5[%c0_8, %c0_9] : memref<2x1xf32, #tpu.memory_space<vmem>>, vector<2x1xf32>
    tpu.vector_store %arg5[%c0_8, %c0_9], %12 {strides = array<i32>} : memref<2x1xf32, #tpu.memory_space<vmem>>, vector<2x1xf32>,
    %c0_10 = arith.constant 0 : index
    %c0_11 = arith.constant 0 : index
    %14 = vector.load %arg6[%c0_10, %c0_11] : memref<2x1xf32, #tpu.memory_space<vmem>>, vector<2x1xf32>
    %cst_12 = arith.constant dense<0.000000e+00> : vector<2xf32>
    %15 = vector.multi_reduction <add>, %5, %cst_12 [1] : vector<2x256xf32> to vector<2xf32>
    %16 = vector.shape_cast %15 : vector<2xf32> to vector<2x1xf32>
    %17 = arith.addf %14, %16 : vector<2x1xf32>
    %c0_13 = arith.constant 0 : index
    %c0_14 = arith.constant 0 : index
    %18 = vector.load %arg6[%c0_13, %c0_14] : memref<2x1xf32, #tpu.memory_space<vmem>>, vector<2x1xf32>
    tpu.vector_store %arg6[%c0_13, %c0_14], %17 {strides = array<i32>} : memref<2x1xf32, #tpu.memory_space<vmem>>, vector<2x1xf32>,
    return
  }
  func.func @transform_0(%arg0: i32, %arg1: i32) -> (i32, i32) {
    %c0_i32 = arith.constant 0 : i32
    return %arg0, %arg1 : i32, i32
  }
  func.func @transform_1(%arg0: i32, %arg1: i32) -> (i32, i32) {
    %c0_i32 = arith.constant 0 : i32
    return %arg0, %arg1 : i32, i32
  }
  func.func @transform_2(%arg0: i32, %arg1: i32) -> (i32, i32) {
    %c0_i32 = arith.constant 0 : i32
    return %arg0, %arg1 : i32, i32
  }
  func.func @transform_3(%arg0: i32, %arg1: i32) -> (i32, i32) {
    %c0_i32 = arith.constant 0 : i32
    %c0_i32_0 = arith.constant 0 : i32
    return %arg0, %c0_i32 : i32, i32
  }
  func.func @transform_4(%arg0: i32, %arg1: i32) -> (i32, i32) {
    %c0_i32 = arith.constant 0 : i32
    %c0_i32_0 = arith.constant 0 : i32
    return %arg0, %c0_i32 : i32, i32
  }
}

</mosaic_0001>

<bundles_post_ra>
// kernel: tpu_custom_call.1
= control target key start
LH: loop header
LB: loop body
LE: loop exit
PB: predicated region body
PF: predicated region fallthrough
CT: control target
= control target key end

     0   :  { %10 = vsyncpa [#allocation3], 0  ;;  %s233_s0 = inlined_call_operand.hbm [shape: f32[2,256], index: 0, kind: input, shape index: {}]   ;;  %s234_s1 = inlined_call_operand.hbm [shape: f32[2,256], index: 1, kind: input, shape index: {}]   ;;  %s235_s2 = inlined_call_operand.vmem [shape: f32[2,256], index: 2, kind: input, shape index: {}]   ;;  %s236_s3 = inlined_call_operand.vmem [shape: f32[2,1], index: 3, kind: output, shape index: {0}]   ;;  %s237_s4 = inlined_call_operand.vmem [shape: f32[2,1], index: 4, kind: output, shape index: {1}]  }
   0x1   :  { %11 = vsyncpa [#allocation5], 0  ;;  %s155_s15 = smov [#allocation2]   ;;  %s156_s17 = smov [#allocation4]  }
   0x2   :  { %s18_s16 = sshll.u32 %s155_s15, 4  ;;  %s28_s18 = sshll.u32 %s156_s17, 4  ;;  %s19_s16 = int_to_ptr.vmem [resolvable:$true] %s18_s16  ;;  %s29_s18 = int_to_ptr.vmem [resolvable:$true] %s28_s18 }
   0x3   :  { %s107_s21 = scalar_lea.hbm %s233_s0, 64 }
   0x4   :  { %p108_p0 = scmp.ne.s32.totalorder %s233_s0, %s107_s21  ;;  %p111_p1 = scmp.lt.u32.totalorder %s107_s21, %s233_s0 }
   0x6   :  { %p113_p2 = pnand %p111_p1, %p108_p0 }
   0x8   :  { %116 = shalt.err (!%p113_p2)
}
   0x9   :  { %s117_s26 = scalar_lea.vmem %s19_s16, 64  ;;  %p122_p4 = scmp.lt.s32.totalorder %s19_s16, %s19_s16 }
   0xa   :  { %p118_p3 = scmp.ne.s32.totalorder %s19_s16, %s117_s26  ;;  %p123_p5 = scmp.lt.s32.totalorder %s117_s26, %s117_s26 }
   0xc   :  { %p124_p6 = por %p123_p5, %p122_p4 }
   0xe   :  { %p125_p7 = pnand %p124_p6, %p118_p3 }
  0x10   :  { %128 = shalt.err (!%p125_p7)
}
  0x11   :  { %21 = dma.hbm_to_vmem [thread:$0]  %s233_s0, 64, %s19_s16, [#allocation3]  }
  0x12   :  { %s129_s5 = scalar_lea.hbm %s234_s1, 64 }
  0x13   :  { %p130_p8 = scmp.ne.s32.totalorder %s234_s1, %s129_s5  ;;  %p133_p9 = scmp.lt.u32.totalorder %s129_s5, %s234_s1 }
  0x15   :  { %p135_p10 = pnand %p133_p9, %p130_p8 }
  0x17   :  { %138 = shalt.err (!%p135_p10)
}
  0x18   :  { %s139_s10 = scalar_lea.vmem %s29_s18, 64  ;;  %p144_p12 = scmp.lt.s32.totalorder %s29_s18, %s29_s18 }
  0x19   :  { %p140_p11 = scmp.ne.s32.totalorder %s29_s18, %s139_s10  ;;  %p145_p13 = scmp.lt.s32.totalorder %s139_s10, %s139_s10 }
  0x1b   :  { %p146_p0 = por %p145_p13, %p144_p12 }
  0x1d   :  { %p147_p1 = pnand %p146_p0, %p140_p11 }
  0x1f   :  { %150 = shalt.err (!%p147_p1)
}
  0x20   :  { %31 = dma.hbm_to_vmem [thread:$0]  %s234_s1, 64, %s29_s18, [#allocation5]  }
  0x21   :  { %151 = dma.done.wait [#allocation3], 64  }
  0x22   :  { %152 = vsyncadd [#allocation3], 4294967232 }
  0x23   :  { %153 = dma.done.wait [#allocation5], 64  }
  0x24   :  { %154 = vsyncadd [#allocation5], 4294967232  ;;  %v58_v0 = vlaneseq  ;;  %vm44_vm0 = vcmask 1024   ;;  %v157_v1 = vmov 1983009808   ;;  %v158_v3 = vmov 0.0  }
  0x25   :  { %v56_v2 = vunpack.c.l.s4 %v157_v1  ;;  %45 = vst.msk [vmem:[%s236_s3] sm:$0x3] %vm44_vm0, %v158_v3  ;;  %46 = vst.msk [vmem:[%s237_s4] sm:$0x3] %vm44_vm0, %v158_v3  ;;  %v47_v6 = vld [vmem:[#allocation2] sm:$0xf] }
  0x26   :  { %v59_v5 = vshrl.u32 %v58_v0, 7  ;;  %v48_v7 = vld [vmem:[#allocation4] sm:$0xf]  ;;  %v49_v8 = vld [vmem:[%s235_s2] sm:$0xf]  ;;  %vm65_vm1 = vcmask 1041408  }
  0x27   :  { %v57_v4 = vunpack.c.0.s8 %v56_v2  ;;  %v50_v9 = vsub.f32 %v47_v6, %v48_v7 }
  0x29   :  { %v60_v10 = vsub.s32 %v57_v4, %v59_v5  ;;  %v51_v11 = vmul.f32 %v50_v9, %v49_v8 }
  0x2b   :  { %v82_v12 = vrot.slane %v49_v8, %v60_v10  ;;  %v53_v13 = vmul.f32 %v51_v11, %v51_v11 }
  0x2c   :  { %v52_v23 = vld [vmem:[%s236_s3] sm:$0x3] }
  0x2d   :  { %v61_v14 = vrot.slane %v53_v13, %v60_v10  ;;  %v83_v15 = vcombine.high %v82_v12, %v82_v12  ;;  %v86_v19 = vsel %vm65_vm1, %v82_v12, 0.0  ;;  %v74_v26 = vld [vmem:[%s237_s4] sm:$0x3] }
  0x2f   :  { %v62_v16 = vcombine.high %v61_v14, %v61_v14  ;;  %v66_v17 = vsel %vm65_vm1, %v61_v14, 0.0  ;;  %v87_v20 = vsel %vm65_vm1, %v83_v15, 0.0 }
  0x30   :  { %v88_v22 = vadd.f32 %v87_v20, %v86_v19 }
  0x31   :  { %v67_v18 = vsel %vm65_vm1, %v62_v16, 0.0 }
  0x32   :  { %v68_v21 = vadd.f32 %v67_v18, %v66_v17 }
  0x34   :  { %69 = vadd.xlane.f32.xlu0 %v68_v21 }
  0x38   :  { %89 = vadd.xlane.f32.xlu0 %v88_v22 }
  0xc1   :  { %v70_v24 = vpop.xlane.xlu0 %69 }
  0xc2   :  { %v71_v25 = vadd.f32 %v70_v24, %v52_v23 }
  0xc4   :  { %73 = vst.msk [vmem:[%s236_s3] sm:$0x3] %vm44_vm0, %v71_v25 }
  0xc5   :  { %v90_v27 = vpop.xlane.xlu0 %89 }
  0xc6   :  { %v91_v28 = vadd.f32 %v90_v27, %v74_v26 }
  0xc8   :  { %92 = vst.msk [vmem:[%s237_s4] sm:$0x3] %vm44_vm0, %v91_v28 }
  0xc9   :  { %101 = vsyncpa [#allocation3], 1 }
  0xca   :  { %102 = vsyncpa [#allocation5], 1 }

</bundles_post_ra>
